<compile_context>
chip_gen: v5e
topology: v5e:2x2
jax: 0.10.0
libtpu: 0.0.40
codegen_flags: <defaults>
</compile_context>

<pallas_src>
import functools

import jax
import jax.numpy as jnp
from jax.experimental import pallas as pl
from jax.experimental.pallas import tpu as pltpu

_SUBLANE = 8
_ROW_ALIGN = 16                      # bf16 sublane packing: 16 rows / packed vreg
_MAX_BATCH_TILE = 1024               # big tiles amortize ~0.35us per-step cost
_COMPUTE_DTYPE = jnp.bfloat16        # MXU-native; accumulation stays f32
_SINGLE_BUFFER_BYTES = 2 << 20       # above this, resident weights use Buffered(1)
_VMEM_RAISE_BYTES = 30 << 20         # only raise vmem_limit_bytes past this


def _round_up(x, m):
    return ((x + m - 1) // m) * m


def _cdiv(a, b):
    return (a + b - 1) // b


def _mlp_kernel(x_ref, w1_ref, b1_ref, w2_ref, b2_ref, w3_ref, b3_ref, o_ref):
    # x arrives f32 from HBM (4 B/elem, no wrapper cast pass); cast to bf16 on
    # the VPU right before the MXU dot -- the cast hides under the matmul.
    x = x_ref[...].astype(w1_ref.dtype)
    # fc1 + relu: bf16 matmul -> f32 accumulate -> f32 bias/ReLU on the VPU
    h1 = jnp.dot(x, w1_ref[...], preferred_element_type=jnp.float32)
    h1 = jnp.maximum(h1 + b1_ref[...], 0.0)
    # fc2 + relu
    h2 = jnp.dot(h1.astype(w2_ref.dtype), w2_ref[...],
                 preferred_element_type=jnp.float32)
    h2 = jnp.maximum(h2 + b2_ref[...], 0.0)
    # fc3 (no activation); output tile is [tB, out_size] at the real out_size
    out = jnp.dot(h2.astype(w3_ref.dtype), w3_ref[...],
                  preferred_element_type=jnp.float32)
    o_ref[...] = (out + b3_ref[...]).astype(o_ref.dtype)


def _stacked_forward(x, stacked, out_dtype=jnp.float32):
    """x: [B, in]. stacked: params with a leading net axis N.

    Weights are stored transposed vs PyTorch (W: [in, out]) so the hot path is
    plain [tB, in] @ [in, out] MXU matmuls. Returns [N, B, out_size] out_dtype.
    """
    w1, b1, w2, b2, w3, b3 = (stacked[k] for k in ("w1", "b1", "w2", "b2", "w3", "b3"))
    num_nets = w1.shape[0]
    B, in_size = x.shape
    hidden_size = w1.shape[2]
    out_size = w3.shape[2]

    # --- batch tiling -------------------------------------------------------
    B_aligned = _round_up(B, _ROW_ALIGN)
    tB = min(_MAX_BATCH_TILE, B_aligned)
    # v7x: with a single net, make sure there are >=2 parallel grid points so
    # both TensorCores get work (harmless on v5e/v6e).
    if num_nets == 1 and _ROW_ALIGN < B_aligned <= _MAX_BATCH_TILE:
        tB = _round_up(_cdiv(B_aligned, 2), _ROW_ALIGN)
    B_pad = _round_up(B, tB)
    if B_pad != B:
        x = jnp.pad(x, ((0, B_pad - B), (0, 0)))   # x stays f32; cast is in-kernel
    num_batch_tiles = B_pad // tB

    # Weights pre-cast to bf16 once (tiny, reused every step); biases stay f32.
    w1, w2, w3 = (w.astype(_COMPUTE_DTYPE) for w in (w1, w2, w3))
    b1, b2, b3 = (b.astype(jnp.float32) for b in (b1, b2, b3))

    # --- per-net resident weight/bias blocks --------------------------------
    # Full-extent tile, re-DMA'd only when the net index changes; single-buffer
    # them once large enough that double-buffering would waste VMEM.
    def net_resident(a):
        per_net_bytes = (a.size // num_nets) * a.dtype.itemsize
        kwargs = {}
        if per_net_bytes > _SINGLE_BUFFER_BYTES:
            kwargs["pipeline_mode"] = pl.Buffered(1)
        return pl.BlockSpec(
            (pl.Squeezed(),) + a.shape[1:],
            lambda n, i, nd=a.ndim: (n,) + (0,) * (nd - 1),
            **kwargs,
        )

    # --- rough VMEM estimate -> only raise the limit when actually needed ---
    def _per_net_bytes(a):
        nbuf = 1 if (a.size // num_nets) * a.dtype.itemsize > _SINGLE_BUFFER_BYTES else 2
        return (a.size // num_nets) * a.dtype.itemsize * nbuf

    est_vmem = (
        2 * tB * in_size * 4                    # x double buffer (f32)
        + 2 * tB * out_size * jnp.dtype(out_dtype).itemsize
        + sum(_per_net_bytes(a) for a in (w1, b1, w2, b2, w3, b3))
        + 4 * tB * hidden_size * 4              # activation headroom
    )
    vmem_limit = None
    if est_vmem > _VMEM_RAISE_BYTES:
        vmem_limit = min(est_vmem + (8 << 20), 64 << 20)

    out = pl.pallas_call(
        _mlp_kernel,
        out_shape=jax.ShapeDtypeStruct((num_nets, B_pad, out_size), out_dtype),
        grid_spec=pltpu.PrefetchScalarGridSpec(
            num_scalar_prefetch=0,
            grid=(num_nets, num_batch_tiles),
            in_specs=[
                pl.BlockSpec((tB, in_size), lambda n, i: (i, 0)),  # x tile per step
                net_resident(w1), net_resident(b1),
                net_resident(w2), net_resident(b2),
                net_resident(w3), net_resident(b3),
            ],
            out_specs=pl.BlockSpec(
                (pl.Squeezed(), tB, out_size), lambda n, i: (n, i, 0)),
        ),
        compiler_params=pltpu.CompilerParams(
            dimension_semantics=("parallel", "parallel"),
            vmem_limit_bytes=vmem_limit),
    )(x, w1, b1, w2, b2, w3, b3)

    if B_pad != B:
        out = out[:, :B, :]
    return out


def double_dqn_forward(x, params, out_dtype=jnp.float32):
    """Single-network forward, matching DoubleDQN.forward."""
    stacked = {k: v[None] for k, v in params.items()}
    return _stacked_forward(x, stacked, out_dtype)[0]


def double_dqn_forward_fused(x, online_params, target_params, out_dtype=jnp.float32):
    """Fused online+target forward: one pallas_call, size-2 net grid axis."""
    stacked = {k: jnp.stack([online_params[k], target_params[k]])
               for k in online_params}
    q = _stacked_forward(x, stacked, out_dtype)
    return q[0], q[1]


def init_params(key, input_size, hidden_size, output_size):
    """Deterministic init mimicking nn.Linear default (uniform(+/- 1/sqrt(fan_in)))."""
    ks = jax.random.split(key, 6)

    def linear(kw, kb, fan_in, fan_out):
        bound = 1.0 / jnp.sqrt(float(fan_in))
        w = jax.random.uniform(kw, (fan_in, fan_out), jnp.float32, -bound, bound)
        b = jax.random.uniform(kb, (1, fan_out), jnp.float32, -bound, bound)
        return w, b

    w1, b1 = linear(ks[0], ks[1], input_size, hidden_size)
    w2, b2 = linear(ks[2], ks[3], hidden_size, hidden_size)
    w3, b3 = linear(ks[4], ks[5], hidden_size, output_size)
    return {"w1": w1, "b1": b1, "w2": w2, "b2": b2, "w3": w3, "b3": b3}


def _reference_bf16(x, p):
    """Pure-JAX reference with the same bf16-matmul / f32-accumulate recipe."""
    cd, f32 = _COMPUTE_DTYPE, jnp.float32
    h = jnp.maximum(
        jnp.dot(x.astype(cd), p["w1"].astype(cd), preferred_element_type=f32) + p["b1"], 0.0)
    h = jnp.maximum(
        jnp.dot(h.astype(cd), p["w2"].astype(cd), preferred_element_type=f32) + p["b2"], 0.0)
    return jnp.dot(h.astype(cd), p["w3"].astype(cd), preferred_element_type=f32) + p["b3"]


def _reference_f32(x, p):
    """All-f32 ground truth (matches the PyTorch module numerically)."""
    h = jnp.maximum(jnp.dot(x, p["w1"], preferred_element_type=jnp.float32) + p["b1"], 0.0)
    h = jnp.maximum(jnp.dot(h, p["w2"], preferred_element_type=jnp.float32) + p["b2"], 0.0)
    return jnp.dot(h, p["w3"], preferred_element_type=jnp.float32) + p["b3"]


if __name__ == "__main__":
    key = jax.random.PRNGKey(0)
    k_x, k_on, k_tgt = jax.random.split(key, 3)

    batch, input_size, hidden_size, output_size = 8, 16, 32, 8
    x = jax.random.normal(k_x, (batch, input_size), jnp.float32)
    online = init_params(k_on, input_size, hidden_size, output_size)
    target = init_params(k_tgt, input_size, hidden_size, output_size)

    # Single-network forward (the original module's forward()).
    q = jax.block_until_ready(double_dqn_forward(x, online))
    assert q.shape == (batch, output_size)
    assert jnp.allclose(q, _reference_bf16(x, online), atol=2e-3, rtol=2e-3), \
        "single-net mismatch vs bf16-recipe reference"
    assert jnp.allclose(q, _reference_f32(x, online), atol=3e-2, rtol=3e-2), \
        "single-net mismatch vs f32 ground truth"

    # Fused online + target forward in one pallas_call.
    q_on, q_tgt = jax.block_until_ready(double_dqn_forward_fused(x, online, target))
    assert q_on.shape == (batch, output_size) and q_tgt.shape == (batch, output_size)
    assert jnp.allclose(q_on, _reference_bf16(x, online), atol=2e-3, rtol=2e-3), "online mismatch"
    assert jnp.allclose(q_tgt, _reference_bf16(x, target), atol=2e-3, rtol=2e-3), "target mismatch"
    assert jnp.allclose(q_on, _reference_f32(x, online), atol=3e-2, rtol=3e-2), "online f32 mismatch"
    assert jnp.allclose(q_tgt, _reference_f32(x, target), atol=3e-2, rtol=3e-2), "target f32 mismatch"

    print("KERNEL_OK")
</pallas_src>

<mosaic_0001>
module attributes {stable_mosaic.version = 11 : i64} {
  func.func @_mlp_kernel(%arg0: i32, %arg1: i32, %arg2: memref<16x16xf32, #tpu.memory_space<vmem>>, %arg3: memref<1x16x32xbf16, #tpu.memory_space<vmem>>, %arg4: memref<1x1x32xf32, #tpu.memory_space<vmem>>, %arg5: memref<1x32x32xbf16, #tpu.memory_space<vmem>>, %arg6: memref<1x1x32xf32, #tpu.memory_space<vmem>>, %arg7: memref<1x32x8xbf16, #tpu.memory_space<vmem>>, %arg8: memref<1x1x8xf32, #tpu.memory_space<vmem>>, %arg9: memref<1x16x8xf32, #tpu.memory_space<vmem>>) attributes {dimension_semantics = [#tpu.dimension_semantics<parallel>, #tpu.dimension_semantics<parallel>], iteration_bounds = array<i64: 1, 1>, scalar_prefetch = 0 : i64, scratch_operands = 0 : i64, tpu.core_type = #tpu.core_type<tc>, window_params = [{transform_indices = @transform_0, window_bounds = array<i64: 16, 16>}, {transform_indices = @transform_1, window_bounds = array<i64: 1, 16, 32>}, {transform_indices = @transform_2, window_bounds = array<i64: 1, 1, 32>}, {transform_indices = @transform_3, window_bounds = array<i64: 1, 32, 32>}, {transform_indices = @transform_4, window_bounds = array<i64: 1, 1, 32>}, {transform_indices = @transform_5, window_bounds = array<i64: 1, 32, 8>}, {transform_indices = @transform_6, window_bounds = array<i64: 1, 1, 8>}, {transform_indices = @transform_7, window_bounds = array<i64: 1, 16, 8>}]} {
    %c0 = arith.constant 0 : index
    %c0_0 = arith.constant 0 : index
    %0 = vector.load %arg2[%c0, %c0_0] : memref<16x16xf32, #tpu.memory_space<vmem>>, vector<16x16xf32>
    %1 = arith.truncf %0 : vector<16x16xf32> to vector<16x16xbf16>
    %c0_1 = arith.constant 0 : index
    %c0_2 = arith.constant 0 : index
    %c0_3 = arith.constant 0 : index
    %2 = vector.load %arg3[%c0_1, %c0_2, %c0_3] : memref<1x16x32xbf16, #tpu.memory_space<vmem>>, vector<1x16x32xbf16>
    %3 = vector.shape_cast %2 : vector<1x16x32xbf16> to vector<16x32xbf16>
    %cst = arith.constant dense<0.000000e+00> : vector<16x32xf32>
    %4 = tpu.matmul %1, %3, %cst {dimension_numbers = #tpu.dot_dimension_numbers<[1], [0], [0], [1], [0, 0, 1, 1], [], []>} : vector<16x16xbf16>, vector<16x32xbf16>, vector<16x32xf32> -> vector<16x32xf32>
    %c0_4 = arith.constant 0 : index
    %c0_5 = arith.constant 0 : index
    %c0_6 = arith.constant 0 : index
    %5 = vector.load %arg4[%c0_4, %c0_5, %c0_6] : memref<1x1x32xf32, #tpu.memory_space<vmem>>, vector<1x1x32xf32>
    %6 = vector.shape_cast %5 : vector<1x1x32xf32> to vector<1x32xf32>
    %7 = vector.broadcast %6 : vector<1x32xf32> to vector<16x32xf32>
    %8 = arith.addf %4, %7 : vector<16x32xf32>
    %cst_7 = arith.constant 0.000000e+00 : f32
    %9 = vector.broadcast %cst_7 : f32 to vector<16x32xf32>
    %10 = arith.maximumf %8, %9 : vector<16x32xf32>
    %11 = arith.truncf %10 : vector<16x32xf32> to vector<16x32xbf16>
    %c0_8 = arith.constant 0 : index
    %c0_9 = arith.constant 0 : index
    %c0_10 = arith.constant 0 : index
    %12 = vector.load %arg5[%c0_8, %c0_9, %c0_10] : memref<1x32x32xbf16, #tpu.memory_space<vmem>>, vector<1x32x32xbf16>
    %13 = vector.shape_cast %12 : vector<1x32x32xbf16> to vector<32x32xbf16>
    %cst_11 = arith.constant dense<0.000000e+00> : vector<16x32xf32>
    %14 = tpu.matmul %11, %13, %cst_11 {dimension_numbers = #tpu.dot_dimension_numbers<[1], [0], [0], [1], [0, 0, 1, 1], [], []>} : vector<16x32xbf16>, vector<32x32xbf16>, vector<16x32xf32> -> vector<16x32xf32>
    %c0_12 = arith.constant 0 : index
    %c0_13 = arith.constant 0 : index
    %c0_14 = arith.constant 0 : index
    %15 = vector.load %arg6[%c0_12, %c0_13, %c0_14] : memref<1x1x32xf32, #tpu.memory_space<vmem>>, vector<1x1x32xf32>
    %16 = vector.shape_cast %15 : vector<1x1x32xf32> to vector<1x32xf32>
    %17 = vector.broadcast %16 : vector<1x32xf32> to vector<16x32xf32>
    %18 = arith.addf %14, %17 : vector<16x32xf32>
    %cst_15 = arith.constant 0.000000e+00 : f32
    %19 = vector.broadcast %cst_15 : f32 to vector<16x32xf32>
    %20 = arith.maximumf %18, %19 : vector<16x32xf32>
    %21 = arith.truncf %20 : vector<16x32xf32> to vector<16x32xbf16>
    %c0_16 = arith.constant 0 : index
    %c0_17 = arith.constant 0 : index
    %c0_18 = arith.constant 0 : index
    %22 = vector.load %arg7[%c0_16, %c0_17, %c0_18] : memref<1x32x8xbf16, #tpu.memory_space<vmem>>, vector<1x32x8xbf16>
    %23 = vector.shape_cast %22 : vector<1x32x8xbf16> to vector<32x8xbf16>
    %cst_19 = arith.constant dense<0.000000e+00> : vector<16x8xf32>
    %24 = tpu.matmul %21, %23, %cst_19 {dimension_numbers = #tpu.dot_dimension_numbers<[1], [0], [0], [1], [0, 0, 1, 1], [], []>} : vector<16x32xbf16>, vector<32x8xbf16>, vector<16x8xf32> -> vector<16x8xf32>
    %c0_20 = arith.constant 0 : index
    %c0_21 = arith.constant 0 : index
    %c0_22 = arith.constant 0 : index
    %25 = vector.load %arg8[%c0_20, %c0_21, %c0_22] : memref<1x1x8xf32, #tpu.memory_space<vmem>>, vector<1x1x8xf32>
    %26 = vector.shape_cast %25 : vector<1x1x8xf32> to vector<1x8xf32>
    %27 = vector.broadcast %26 : vector<1x8xf32> to vector<16x8xf32>
    %28 = arith.addf %24, %27 : vector<16x8xf32>
    %c0_23 = arith.constant 0 : index
    %c0_24 = arith.constant 0 : index
    %c0_25 = arith.constant 0 : index
    %29 = vector.load %arg9[%c0_23, %c0_24, %c0_25] : memref<1x16x8xf32, #tpu.memory_space<vmem>>, vector<1x16x8xf32>
    %30 = vector.shape_cast %29 : vector<1x16x8xf32> to vector<16x8xf32>
    %31 = vector.shape_cast %28 : vector<16x8xf32> to vector<1x16x8xf32>
    tpu.vector_store %arg9[%c0_23, %c0_24, %c0_25], %31 {strides = array<i32>} : memref<1x16x8xf32, #tpu.memory_space<vmem>>, vector<1x16x8xf32>,
    return
  }
  func.func @transform_0(%arg0: i32, %arg1: i32) -> (i32, i32) {
    %c0_i32 = arith.constant 0 : i32
    %c0_i32_0 = arith.constant 0 : i32
    return %arg1, %c0_i32 : i32, i32
  }
  func.func @transform_1(%arg0: i32, %arg1: i32) -> (i32, i32, i32) {
    %c0_i32 = arith.constant 0 : i32
    %c0_i32_0 = arith.constant 0 : i32
    %c0_i32_1 = arith.constant 0 : i32
    return %arg0, %c0_i32, %c0_i32_0 : i32, i32, i32
  }
  func.func @transform_2(%arg0: i32, %arg1: i32) -> (i32, i32, i32) {
    %c0_i32 = arith.constant 0 : i32
    %c0_i32_0 = arith.constant 0 : i32
    %c0_i32_1 = arith.constant 0 : i32
    return %arg0, %c0_i32, %c0_i32_0 : i32, i32, i32
  }
  func.func @transform_3(%arg0: i32, %arg1: i32) -> (i32, i32, i32) {
    %c0_i32 = arith.constant 0 : i32
    %c0_i32_0 = arith.constant 0 : i32
    %c0_i32_1 = arith.constant 0 : i32
    return %arg0, %c0_i32, %c0_i32_0 : i32, i32, i32
  }
  func.func @transform_4(%arg0: i32, %arg1: i32) -> (i32, i32, i32) {
    %c0_i32 = arith.constant 0 : i32
    %c0_i32_0 = arith.constant 0 : i32
    %c0_i32_1 = arith.constant 0 : i32
    return %arg0, %c0_i32, %c0_i32_0 : i32, i32, i32
  }
  func.func @transform_5(%arg0: i32, %arg1: i32) -> (i32, i32, i32) {
    %c0_i32 = arith.constant 0 : i32
    %c0_i32_0 = arith.constant 0 : i32
    %c0_i32_1 = arith.constant 0 : i32
    return %arg0, %c0_i32, %c0_i32_0 : i32, i32, i32
  }
  func.func @transform_6(%arg0: i32, %arg1: i32) -> (i32, i32, i32) {
    %c0_i32 = arith.constant 0 : i32
    %c0_i32_0 = arith.constant 0 : i32
    %c0_i32_1 = arith.constant 0 : i32
    return %arg0, %c0_i32, %c0_i32_0 : i32, i32, i32
  }
  func.func @transform_7(%arg0: i32, %arg1: i32) -> (i32, i32, i32) {
    %c0_i32 = arith.constant 0 : i32
    %c0_i32_0 = arith.constant 0 : i32
    return %arg0, %arg1, %c0_i32 : i32, i32, i32
  }
}

</mosaic_0001>

<bundles_post_ra>
// kernel: tpu_custom_call.1
= control target key start
LH: loop header
LB: loop body
LE: loop exit
PB: predicated region body
PF: predicated region fallthrough
CT: control target
= control target key end

     0   :  { %12 = vsyncpa [#allocation3], 0  ;;  %s346_s0 = inlined_call_operand.vmem [shape: f32[16,16], index: 0, kind: input, shape index: {}]   ;;  %s347_s1 = inlined_call_operand.hbm [shape: bf16[1,16,32], index: 1, kind: input, shape index: {}]   ;;  %s348_s2 = inlined_call_operand.vmem [shape: f32[1,1,32], index: 2, kind: input, shape index: {}]   ;;  %s349_s3 = inlined_call_operand.hbm [shape: bf16[1,32,32], index: 3, kind: input, shape index: {}]   ;;  %s350_s4 = inlined_call_operand.vmem [shape: f32[1,1,32], index: 4, kind: input, shape index: {}]   ;;  %s351_s5 = inlined_call_operand.vmem [shape: bf16[1,32,8], index: 5, kind: input, shape index: {}]   ;;  %s352_s6 = inlined_call_operand.vmem [shape: f32[1,1,8], index: 6, kind: input, shape index: {}]   ;;  %s353_s7 = inlined_call_operand.vmem [shape: f32[1,16,8], index: 7, kind: output, shape index: {}]  }
   0x1   :  { %s20_s26 = sshll.u32 %s347_s1, 4  ;;  %s21_s26 = int_to_ptr.hbm [resolvable:$true] %s20_s26 }
   0x2   :  { %13 = vsyncpa [#allocation5], 0  ;;  %s269_s27 = smov [#allocation2]   ;;  %s35_s8 = sshll.u32 %s349_s3, 4  ;;  %s36_s8 = int_to_ptr.hbm [resolvable:$true] %s35_s8 }
   0x3   :  { %s22_s28 = sshll.u32 %s269_s27, 4  ;;  %s270_s9 = smov 64   ;;  %s23_s28 = int_to_ptr.vmem [resolvable:$true] %s22_s28 }
   0x4   :  { %s271_s10 = smov 4   ;;  %s272_s11 = smov [#allocation4]  }
   0x5   :  { %28 = dma.hbm_to_vmem [thread:$0]  %s21_s26, 128, %s23_s28, [#allocation3], %s270_s9, %s270_s9, %s271_s10  }
   0x6   :  { %s37_s12 = sshll.u32 %s272_s11, 4  ;;  %s38_s12 = int_to_ptr.vmem [resolvable:$true] %s37_s12 }
   0x7   :  { %43 = dma.hbm_to_vmem [thread:$0]  %s36_s8, 256, %s38_s12, [#allocation5], %s270_s9, %s270_s9, %s271_s10  }
   0x8   :  { %265 = dma.done.wait [#allocation3], 128  }
   0x9   :  { %266 = vsyncadd [#allocation3], 4294967168 }
   0xa   :  { %267 = dma.done.wait [#allocation5], 256  }
   0xb   :  { %268 = vsyncadd [#allocation5], 4294967040  ;;  %v205_v0 = vld [vmem:[#allocation2] sm:$0xff]  ;;  %v60_v2 = vld [vmem:[%s346_s0 + $0x8] sm:$0xff]  ;;  %vm74_vm0 = vcmask 130048   ;;  %vm115_vm1 = vcmask 261120  }
   0xc   :  { %v59_v1 = vld [vmem:[%s346_s0] sm:$0xff]  ;;  %85 = vmatpush.bf16.msra.mxu0 %v205_v0  ;;  %v207_v4 = vld [vmem:[#allocation4 + $0x8] sm:$0xff]  ;;  %v206_v5 = vld [vmem:[#allocation4] sm:$0xff]  ;;  %vm173_vm2 = vcmask 64512  }
   0xd   :  { %v61_v3 = vpack.c.bf16 %v60_v2, %v59_v1  ;;  %125 = vmatpush.bf16.msra.mxu1 %v207_v4  ;;  %v214_v7 = vld [vmem:[%s348_s2] ss:$0 sm:$0xff]  ;;  %v209_v14 = vld [vmem:[%s351_s5 + $0x8] sm:$0xff] }
   0xe   :  { %165 = vmatpush.bf16.msra.mxu2 %v209_v14  ;;  %v208_v15 = vld [vmem:[%s351_s5] sm:$0xff] }
   0xf   :  { %186 = vmatmul.msk.bf16.vlgmr.msra.gmra.mxu0 %vm74_vm0, %v61_v3  ;;  %v215_v17 = vld [vmem:[%s350_s4] ss:$0 sm:$0xff] }
  0x10   :  { %v216_v24 = vld [vmem:[%s352_s6] ss:$0 sm:$0xff] }
  0x11   :  { %126 = vmatpush.bf16.msra.mxu1 %v206_v5 }
  0x12   :  { %166 = vmatpush.bf16.msra.mxu2 %v208_v15 }
  0x8c   :  { %v87_v6 = vpop.f32.mrf.mxu0 }
  0x8d   :  { %v88_v8 = vadd.f32 %v214_v7, %v87_v6 }
  0x8f   :  { %v92_v11 = vmax.f32 %v88_v8, 0.0 }
  0x94   :  { %v89_v9 = vpop.f32.mrf.mxu0 }
  0x95   :  { %v90_v10 = vadd.f32 %v214_v7, %v89_v9 }
  0x97   :  { %v93_v12 = vmax.f32 %v90_v10, 0.0 }
  0x99   :  { %v94_v13 = vpack.c.bf16 %v93_v12, %v92_v11 }
  0x9b   :  { %195 = vmatmul.msk.bf16.vlgmr.msra.gmra.mxu1 %vm115_vm1, %v94_v13 }
 0x118   :  { %v128_v16 = vpop.f32.mrf.mxu1 }
 0x119   :  { %v129_v18 = vadd.f32 %v215_v17, %v128_v16 }
 0x11b   :  { %v133_v21 = vmax.f32 %v129_v18, 0.0 }
 0x120   :  { %v130_v19 = vpop.f32.mrf.mxu1 }
 0x121   :  { %v131_v20 = vadd.f32 %v215_v17, %v130_v19 }
 0x123   :  { %v134_v22 = vmax.f32 %v131_v20, 0.0 }
 0x125   :  { %v135_v23 = vpack.c.bf16 %v134_v22, %v133_v21 }
 0x127   :  { %204 = vmatmul.msk.bf16.vlgmr.msra.gmra.mxu2 %vm115_vm1, %v135_v23 }
 0x1aa   :  { %v168_v25 = vpop.f32.mrf.mxu2 }
 0x1ab   :  { %v169_v26 = vadd.f32 %v216_v24, %v168_v25 }
 0x1ad   :  { %174 = vst.msk [vmem:[%s353_s7] sm:$0xff] %vm173_vm2, %v169_v26 }
 0x1b2   :  { %v170_v27 = vpop.f32.mrf.mxu2 }
 0x1b3   :  { %v171_v28 = vadd.f32 %v216_v24, %v170_v27 }
 0x1b5   :  { %175 = vst.msk [vmem:[%s353_s7 + $0x8] sm:$0xff] %vm173_vm2, %v171_v28 }
 0x1b6   :  { %180 = vsyncpa [#allocation3], 1 }
 0x1b7   :  { %181 = vsyncpa [#allocation5], 1 }

</bundles_post_ra>
